<compile_context>
chip_gen: v5e
topology: v5e:2x2
jax: 0.10.0
libtpu: 0.0.40
codegen_flags: <defaults>
</compile_context>

<pallas_src>
import jax
import jax.numpy as jnp
from jax.experimental import pallas as pl
from jax.experimental.pallas import tpu as pltpu


def mlp_kernel(x_ref, w1_ref, b1_ref, w2_ref, b2_ref, w3_ref, b3_ref, o_ref):
    # Transposed layout: batch is the lane (last) axis.
    #   x_ref : (4, Bt)     w* : (out, in)     b* : (out, 1)     o_ref : (2, Bt)
    x = x_ref[...]

    h1 = jnp.dot(w1_ref[...], x, preferred_element_type=jnp.float32) + b1_ref[...]
    h1 = jnp.maximum(h1, 0.0)

    h2 = jnp.dot(w2_ref[...], h1, preferred_element_type=jnp.float32) + b2_ref[...]
    h2 = jnp.maximum(h2, 0.0)

    out = jnp.dot(w3_ref[...], h2, preferred_element_type=jnp.float32) + b3_ref[...]
    o_ref[...] = out.astype(o_ref.dtype)


def policy_network_forward(x, params, *, batch_tile=512):
    """x: (B, 4) float32 -> (B, 2) float32.

    params: PyTorch-layout weights (out, in) and biases (out, 1).
    """
    w1, b1, w2, b2, w3, b3 = params
    B = x.shape[0]
    in_dim = w1.shape[1]
    out_dim = w3.shape[0]

    # Batch tile on the lane axis: must be a multiple of 128 for lane-dense,
    # unmasked loads/stores.
    bt = max(128, (batch_tile // 128) * 128)
    n_tiles = pl.cdiv(B, bt)
    Bp = n_tiles * bt

    # (B, 4) -> (4, Bp): batch on the lane axis, zero-padded to a tile multiple.
    xt = jnp.zeros((in_dim, Bp), x.dtype).at[:, :B].set(x.T)

    # Weights/biases stay VMEM-resident across all grid steps.
    const = lambda a: pl.BlockSpec(a.shape, lambda i: (0, 0))

    flops = 2 * B * (4 * 8 + 8 * 8 + 8 * 2)
    bytes_accessed = 4 * Bp * (in_dim + out_dim) + sum(4 * int(a.size) for a in params)
    cost = pl.CostEstimate(flops=flops, transcendentals=0,
                           bytes_accessed=bytes_accessed)

    out_t = pl.pallas_call(
        mlp_kernel,
        out_shape=jax.ShapeDtypeStruct((out_dim, Bp), jnp.float32),
        grid=(n_tiles,),
        in_specs=[
            pl.BlockSpec((in_dim, bt), lambda i: (0, i)),   # x tile: lane-dense batch
            const(w1), const(b1), const(w2), const(b2), const(w3), const(b3),
        ],
        out_specs=pl.BlockSpec((out_dim, bt), lambda i: (0, i)),
        compiler_params=pltpu.CompilerParams(
            dimension_semantics=("parallel",),      # v7x: shard batch over 2 TCs
            vmem_limit_bytes=32 * 1024 * 1024,
        ),
        cost_estimate=cost,
    )(xt, w1, b1, w2, b2, w3, b3)

    # (2, Bp) -> (B, 2), dropping the pad columns.
    return out_t[:, :B].T


def init_params(key):
    """PyTorch nn.Linear default init: U[-1/sqrt(fan_in), +1/sqrt(fan_in)].

    Weights stored PyTorch-style as (out, in); biases as (out, 1) so they
    broadcast over the lane (batch) axis inside the kernel.
    """
    def linear(key, fan_in, fan_out):
        kw, kb = jax.random.split(key)
        bound = 1.0 / jnp.sqrt(fan_in)
        w = jax.random.uniform(kw, (fan_out, fan_in), jnp.float32, -bound, bound)
        b = jax.random.uniform(kb, (fan_out, 1), jnp.float32, -bound, bound)
        return w, b

    k1, k2, k3 = jax.random.split(key, 3)
    w1, b1 = linear(k1, 4, 8)
    w2, b2 = linear(k2, 8, 8)
    w3, b3 = linear(k3, 8, 2)
    return (w1, b1, w2, b2, w3, b3)


if __name__ == "__main__":
    key = jax.random.PRNGKey(0)
    k_params, k_x = jax.random.split(key)

    params = init_params(k_params)

    # CartPole observation dim = 4. Batch deliberately NOT a multiple of the
    # tile to exercise the padding path; tile=256 -> padded batch 512, grid=(2,).
    B = 300
    x = jax.random.normal(k_x, (B, 4), jnp.float32)

    out = jax.block_until_ready(policy_network_forward(x, params, batch_tile=256))

    # Pure-JAX reference of the PyTorch forward semantics.
    w1, b1, w2, b2, w3, b3 = params
    ref = jnp.maximum(x @ w1.T + b1.T, 0.0)
    ref = jnp.maximum(ref @ w2.T + b2.T, 0.0)
    ref = ref @ w3.T + b3.T

    assert out.shape == (B, 2)
    assert jnp.allclose(out, ref, atol=1e-5, rtol=1e-5)

    print("KERNEL_OK")
</pallas_src>

<mosaic_0001>
module attributes {stable_mosaic.version = 11 : i64} {
  func.func @mlp_kernel(%arg0: i32, %arg1: memref<4x256xf32, #tpu.memory_space<vmem>>, %arg2: memref<8x4xf32, #tpu.memory_space<vmem>>, %arg3: memref<8x1xf32, #tpu.memory_space<vmem>>, %arg4: memref<8x8xf32, #tpu.memory_space<vmem>>, %arg5: memref<8x1xf32, #tpu.memory_space<vmem>>, %arg6: memref<2x8xf32, #tpu.memory_space<vmem>>, %arg7: memref<2x1xf32, #tpu.memory_space<vmem>>, %arg8: memref<2x256xf32, #tpu.memory_space<vmem>>) attributes {dimension_semantics = [#tpu.dimension_semantics<parallel>], iteration_bounds = array<i64: 2>, scalar_prefetch = 0 : i64, scratch_operands = 0 : i64, tpu.core_type = #tpu.core_type<tc>, window_params = [{transform_indices = @transform_0, window_bounds = array<i64: 4, 256>}, {pipeline_mode = #tpu.pipeline_mode<synchronous>, transform_indices = @transform_1, window_bounds = array<i64: 8, 4>}, {pipeline_mode = #tpu.pipeline_mode<synchronous>, transform_indices = @transform_2, window_bounds = array<i64: 8, 1>}, {pipeline_mode = #tpu.pipeline_mode<synchronous>, transform_indices = @transform_3, window_bounds = array<i64: 8, 8>}, {pipeline_mode = #tpu.pipeline_mode<synchronous>, transform_indices = @transform_4, window_bounds = array<i64: 8, 1>}, {pipeline_mode = #tpu.pipeline_mode<synchronous>, transform_indices = @transform_5, window_bounds = array<i64: 2, 8>}, {pipeline_mode = #tpu.pipeline_mode<synchronous>, transform_indices = @transform_6, window_bounds = array<i64: 2, 1>}, {transform_indices = @transform_7, window_bounds = array<i64: 2, 256>}]} {
    %c0 = arith.constant 0 : index
    %c0_0 = arith.constant 0 : index
    %0 = vector.load %arg1[%c0, %c0_0] : memref<4x256xf32, #tpu.memory_space<vmem>>, vector<4x256xf32>
    %c0_1 = arith.constant 0 : index
    %c0_2 = arith.constant 0 : index
    %1 = vector.load %arg2[%c0_1, %c0_2] : memref<8x4xf32, #tpu.memory_space<vmem>>, vector<8x4xf32>
    %cst = arith.constant dense<0.000000e+00> : vector<8x256xf32>
    %2 = tpu.matmul %1, %0, %cst {dimension_numbers = #tpu.dot_dimension_numbers<[1], [0], [0], [1], [0, 0, 1, 1], [], []>} : vector<8x4xf32>, vector<4x256xf32>, vector<8x256xf32> -> vector<8x256xf32>
    %c0_3 = arith.constant 0 : index
    %c0_4 = arith.constant 0 : index
    %3 = vector.load %arg3[%c0_3, %c0_4] : memref<8x1xf32, #tpu.memory_space<vmem>>, vector<8x1xf32>
    %4 = vector.broadcast %3 : vector<8x1xf32> to vector<8x256xf32>
    %5 = arith.addf %2, %4 : vector<8x256xf32>
    %cst_5 = arith.constant 0.000000e+00 : f32
    %6 = vector.broadcast %cst_5 : f32 to vector<8x256xf32>
    %7 = arith.maximumf %5, %6 : vector<8x256xf32>
    %c0_6 = arith.constant 0 : index
    %c0_7 = arith.constant 0 : index
    %8 = vector.load %arg4[%c0_6, %c0_7] : memref<8x8xf32, #tpu.memory_space<vmem>>, vector<8x8xf32>
    %cst_8 = arith.constant dense<0.000000e+00> : vector<8x256xf32>
    %9 = tpu.matmul %8, %7, %cst_8 {dimension_numbers = #tpu.dot_dimension_numbers<[1], [0], [0], [1], [0, 0, 1, 1], [], []>} : vector<8x8xf32>, vector<8x256xf32>, vector<8x256xf32> -> vector<8x256xf32>
    %c0_9 = arith.constant 0 : index
    %c0_10 = arith.constant 0 : index
    %10 = vector.load %arg5[%c0_9, %c0_10] : memref<8x1xf32, #tpu.memory_space<vmem>>, vector<8x1xf32>
    %11 = vector.broadcast %10 : vector<8x1xf32> to vector<8x256xf32>
    %12 = arith.addf %9, %11 : vector<8x256xf32>
    %cst_11 = arith.constant 0.000000e+00 : f32
    %13 = vector.broadcast %cst_11 : f32 to vector<8x256xf32>
    %14 = arith.maximumf %12, %13 : vector<8x256xf32>
    %c0_12 = arith.constant 0 : index
    %c0_13 = arith.constant 0 : index
    %15 = vector.load %arg6[%c0_12, %c0_13] : memref<2x8xf32, #tpu.memory_space<vmem>>, vector<2x8xf32>
    %cst_14 = arith.constant dense<0.000000e+00> : vector<2x256xf32>
    %16 = tpu.matmul %15, %14, %cst_14 {dimension_numbers = #tpu.dot_dimension_numbers<[1], [0], [0], [1], [0, 0, 1, 1], [], []>} : vector<2x8xf32>, vector<8x256xf32>, vector<2x256xf32> -> vector<2x256xf32>
    %c0_15 = arith.constant 0 : index
    %c0_16 = arith.constant 0 : index
    %17 = vector.load %arg7[%c0_15, %c0_16] : memref<2x1xf32, #tpu.memory_space<vmem>>, vector<2x1xf32>
    %18 = vector.broadcast %17 : vector<2x1xf32> to vector<2x256xf32>
    %19 = arith.addf %16, %18 : vector<2x256xf32>
    %c0_17 = arith.constant 0 : index
    %c0_18 = arith.constant 0 : index
    %20 = vector.load %arg8[%c0_17, %c0_18] : memref<2x256xf32, #tpu.memory_space<vmem>>, vector<2x256xf32>
    tpu.vector_store %arg8[%c0_17, %c0_18], %19 {strides = array<i32>} : memref<2x256xf32, #tpu.memory_space<vmem>>, vector<2x256xf32>,
    return
  }
  func.func @transform_0(%arg0: i32) -> (i32, i32) {
    %c0_i32 = arith.constant 0 : i32
    %c0_i32_0 = arith.constant 0 : i32
    return %c0_i32, %arg0 : i32, i32
  }
  func.func @transform_1(%arg0: i32) -> (i32, i32) {
    %c0_i32 = arith.constant 0 : i32
    %c0_i32_0 = arith.constant 0 : i32
    %c0_i32_1 = arith.constant 0 : i32
    return %c0_i32, %c0_i32_0 : i32, i32
  }
  func.func @transform_2(%arg0: i32) -> (i32, i32) {
    %c0_i32 = arith.constant 0 : i32
    %c0_i32_0 = arith.constant 0 : i32
    %c0_i32_1 = arith.constant 0 : i32
    return %c0_i32, %c0_i32_0 : i32, i32
  }
  func.func @transform_3(%arg0: i32) -> (i32, i32) {
    %c0_i32 = arith.constant 0 : i32
    %c0_i32_0 = arith.constant 0 : i32
    %c0_i32_1 = arith.constant 0 : i32
    return %c0_i32, %c0_i32_0 : i32, i32
  }
  func.func @transform_4(%arg0: i32) -> (i32, i32) {
    %c0_i32 = arith.constant 0 : i32
    %c0_i32_0 = arith.constant 0 : i32
    %c0_i32_1 = arith.constant 0 : i32
    return %c0_i32, %c0_i32_0 : i32, i32
  }
  func.func @transform_5(%arg0: i32) -> (i32, i32) {
    %c0_i32 = arith.constant 0 : i32
    %c0_i32_0 = arith.constant 0 : i32
    %c0_i32_1 = arith.constant 0 : i32
    return %c0_i32, %c0_i32_0 : i32, i32
  }
  func.func @transform_6(%arg0: i32) -> (i32, i32) {
    %c0_i32 = arith.constant 0 : i32
    %c0_i32_0 = arith.constant 0 : i32
    %c0_i32_1 = arith.constant 0 : i32
    return %c0_i32, %c0_i32_0 : i32, i32
  }
  func.func @transform_7(%arg0: i32) -> (i32, i32) {
    %c0_i32 = arith.constant 0 : i32
    %c0_i32_0 = arith.constant 0 : i32
    return %c0_i32, %arg0 : i32, i32
  }
}

</mosaic_0001>

<bundles_post_ra>
// kernel: tpu_custom_call.1
= control target key start
LH: loop header
LB: loop body
LE: loop exit
PB: predicated region body
PF: predicated region fallthrough
CT: control target
= control target key end

     0   :  { %12 = vsyncpa [#allocation3], 0  ;;  %s803_s0 = inlined_call_operand.vmem [shape: f32[4,512], index: 0, kind: input, shape index: {}]   ;;  %s804_s1 = inlined_call_operand.vmem [shape: f32[8,4], index: 1, kind: input, shape index: {}]   ;;  %s805_s2 = inlined_call_operand.vmem [shape: f32[8,1], index: 2, kind: input, shape index: {}]   ;;  %s806_s3 = inlined_call_operand.vmem [shape: f32[8,8], index: 3, kind: input, shape index: {}]   ;;  %s807_s4 = inlined_call_operand.vmem [shape: f32[8,1], index: 4, kind: input, shape index: {}]   ;;  %s808_s5 = inlined_call_operand.vmem [shape: f32[2,8], index: 5, kind: input, shape index: {}]   ;;  %s809_s6 = inlined_call_operand.vmem [shape: f32[2,1], index: 6, kind: input, shape index: {}]   ;;  %s810_s7 = inlined_call_operand.hbm [shape: f32[2,512], index: 7, kind: output, shape index: {}]  }
   0x1   :  { %14 = vsyncpa [#allocation3 + $0x1], 0  ;;  %s697_s24 = smov 0   ;;  %s699_s25 = smov 0  }
   0x2   :  { %s701_s26 = smov 0   ;;  %s703_s27 = smov 0  }
   0x3 LB: > { %s718_s28 = sadd.s32 4294967295, %s654_s27   ;;  %s529_s29 = sadd.s32 4294967294, %s654_s27   ;;  %s654_s27 = sphi %s703_s27, %s816_s27   ;;  %s650_s26 = sphi %s701_s26, %s815_s26   ;;  %s646_s25 = sphi %s699_s25, %s814_s25   ;;  %s642_s24 = sphi %s697_s24, %s813_s24  }
   0x4   : > { %s722_s30 = sadd.s32 1, %s654_s27   ;;  %s179_s8 = sadd.s32 1, %s650_s26 }
   0x5   : > { %s176_s9 = ssub.s32 %s654_s27, %s722_s30  ;;  %p189_p0 = scmp.ne.s32.totalorder %s650_s26, %s646_s25 }
   0x6   : > { %p177_p1 = scmp.eq.s32.totalorder %s176_s9, 0  ;;  %p190_p2 = scmp.eq.s32.totalorder %s718_s28, 1 }
   0x7   : > { %p195_p3 = scmp.ne.s32.totalorder %s646_s25, %s642_s24  ;;  %p196_p4 = scmp.eq.s32.totalorder %s529_s29, 1 }
   0x8   : > { %s733_s10 = scalar_select %p177_p1, %s650_s26, %s179_s8  }
   0x9   : > { %p735_p5 = por %p190_p2, %p189_p0  ;;  %p739_p6 = por %p196_p4, %p195_p3 }
   0xa   : > { %p532_p7 = scmp.ge.s32.totalorder %s654_s27, 1  ;;  %p241_p8 = scmp.lt.s32.totalorder %s654_s27, 3 }
   0xc   : > { %p242_p9 = pnand %p532_p7, %p241_p8 }
   0xd   : > { %s534_s13 = sshll.u32 (!%p242_p9), %s718_s28, 1  ;;  %s549_s18 = sshll.u32 (!%p242_p9), %s718_s28, 2 }
   0xe   : > { %245 = sbr.rel (%p242_p9) target bundleno = 434 (0x1b2), region = 48  ;;  %p274_p10 = scmp.lt.s32.totalorder (!%p242_p9), %s534_s13, 3 }
   0xf   : > { %s465_s21 = scalar_lea.hbm (!%p242_p9), %s810_s7, %s549_s18  ;;  %s612_s15 = scalar_lea.hbm (!%p242_p9), %s810_s7, 8 }
  0x10   : > { %s469_s29 = sshll.u32 (!%p242_p9), %s465_s21, 4  ;;  %s470_s29 = int_to_ptr.hbm [resolvable:$true] %s469_s29 }
  0x11   : > { %s606_s8 = sshra.s32 (!%p242_p9), %s470_s29, 4  ;;  %s607_s8 = int_to_ptr.hbm [resolvable:$true] %s606_s8 }
  0x12   : > { %s608_s9 = scalar_lea.hbm (!%p242_p9), %s607_s8, 4  ;;  %p613_p0 = scmp.lt.s32.totalorder (!%p242_p9), %s607_s8, %s810_s7 }
  0x13   : > { %v282_v0 = vld [vmem:[%s805_s2] sm:$0xff]  ;;  %v656_v1 = vmov 0   ;;  %s818_s13 = smov (!%p274_p10, %s534_s13), 3  ;;  %vm296_vm0 = vcmask 1043456   ;;  %vm292_vm1 = vcmask 31744   ;;  %vm350_vm2 = vcmask 64512   ;;  %p609_p11 = scmp.ne.s32.totalorder %s607_s8, %s608_s9 }
  0x14   : > { %590 = vset.pattern.permute.xlu0 %v656_v1  ;;  %591 = vset.pattern.permute.xlu1 %v656_v1  ;;  %s535_s16 = sshll.u32 %s818_s13, 2  ;;  %v344_v3 = vld [vmem:[%s807_s4] sm:$0xff]  ;;  %vm449_vm3 = vcmask 1041408   ;;  %p614_p1 = scmp.lt.s32.totalorder %s612_s15, %s608_s9 }
  0x15   : > { %285 = vperm.xlu0 %590, %v282_v0   ;;  %s277_s19 = scalar_lea.vmem %s803_s0, %s535_s16  ;;  %v281_v4 = vld [vmem:[%s804_s1] sm:$0xff]  ;;  %s270_s16 = sand.u32 1, %s646_s25  }
  0x16   : > { %v280_v2 = vld [vmem:[%s277_s19] sm:$0xff]  ;;  %s533_s17 = sshll.u32 %s270_s16, 2  ;;  %s454_s28 = scalar_lea.sflag [#allocation3], %s270_s16 }
  0x17   : > { %289 = vst [vmem:[#allocation1] ss:$2 sm:$0xff] %v280_v2  ;;  %v343_v14 = vld [vmem:[%s806_s3] sm:$0xff]  ;;  %s272_s22 = scalar_lea.vmem [#allocation2], %s533_s17  ;;  %p610_p12 = pnand %p609_p11, %p735_p5 }
  0x18   : > { %v397_v15 = vld [vmem:[%s809_s6] sm:$0x3]  ;;  %s467_s23 = sshll.u32 %s272_s22, 4  ;;  %p615_p2 = por %p614_p1, %p613_p0  ;;  %s468_s23 = int_to_ptr.vmem [resolvable:$true] %s467_s23 }
  0x19   : > { %400 = vperm.xlu1 %591, %v397_v15   ;;  %v396_v23 = vld [vmem:[%s808_s5] sm:$0x3]  ;;  %p611_p13 = pneg %p610_p12 }
  0x1b   : > { %p616_p3 = pnand %p615_p2, %p611_p13 }
  0x1d   : > { %347 = vperm.xlu0 %590, %v344_v3  }
  0x1e   : > { %v290_v5 = vld.sshfl [vmem:[#allocation1] sm:$0xff pattern:$0x75316420]  ;;  %v291_v6 = vld.sshfl [vmem:[#allocation1 + $0x8] sm:$0xff pattern:$0x75316420] }
  0x1f   : > { %536 = vmatpush.msk.msra.mxu0 %vm296_vm0, %v290_v5  ;;  %538 = vmatpush.msk.msra.mxu1 %vm296_vm0, %v291_v6 }
  0x20   : > { %537 = vmatmul.msk.f32.vlgmr.msra.gmra.mxu0 %vm292_vm1, %v281_v4  ;;  %539 = vmatmul.msk.f32.vlgmr.msra.gmra.mxu1 %vm292_vm1, %v281_v4 }
  0x87   : > { %v286_v7 = vpop.permute.xlu0 %285 }
  0x8b   : > { %v401_v24 = vpop.permute.xlu1 %400 }
  0x8f   : > { %v348_v16 = vpop.permute.xlu0 %347 }
  0x9d   : > { %v318_v8 = vpop.f32.mrf.mxu0  ;;  %v338_v9 = vpop.f32.mrf.mxu1 }
  0x9e   : > { %v319_v10 = vadd.f32 %v318_v8, %v286_v7  ;;  %v339_v11 = vadd.f32 %v338_v9, %v286_v7 }
  0xa0   : > { %v341_v12 = vmax.f32 %v319_v10, 0.0  ;;  %v342_v13 = vmax.f32 %v339_v11, 0.0 }
  0xa2   : > { %369 = vmatpush.msra.mxu2 %v341_v12  ;;  %389 = vmatpush.msra.mxu3 %v342_v13 }
  0xa3   : > { %540 = vmatmul.msk.f32.vlgmr.msra.gmra.mxu2 %vm350_vm2, %v343_v14  ;;  %541 = vmatmul.msk.f32.vlgmr.msra.gmra.mxu3 %vm350_vm2, %v343_v14 }
 0x126   : > { %v371_v17 = vpop.f32.mrf.mxu2  ;;  %v391_v18 = vpop.f32.mrf.mxu3 }
 0x127   : > { %v372_v19 = vadd.f32 %v371_v17, %v348_v16  ;;  %v392_v20 = vadd.f32 %v391_v18, %v348_v16 }
 0x129   : > { %v394_v21 = vmax.f32 %v372_v19, 0.0  ;;  %v395_v22 = vmax.f32 %v392_v20, 0.0 }
 0x12b   : > { %421 = vmatpush.msrb.mxu0 %v394_v21  ;;  %441 = vmatpush.msrb.mxu1 %v395_v22 }
 0x12c   : > { %543 = vmatmul.msk.f32.vlgmr.msrb.gmra.mxu1 %vm350_vm2, %v396_v23  ;;  %542 = vmatmul.msk.f32.vlgmr.msrb.gmra.mxu0 %vm350_vm2, %v396_v23 }
 0x1a9   : > { %v443_v25 = vpop.f32.mrf.mxu1  ;;  %v423_v26 = vpop.f32.mrf.mxu0 }
 0x1aa   : > { %v444_v27 = vadd.f32 %v443_v25, %v401_v24  ;;  %v424_v29 = vadd.f32 %v423_v26, %v401_v24 }
 0x1ac   : > { %v448_v28 = vrot.slane %v444_v27, 6 }
 0x1ae   : > { %v450_v30 = vsel %vm449_vm3, %v424_v29, %v448_v28 }
 0x1af   : > { %452 = vst [vmem:[%s272_s22] sm:$0xf] %v450_v30 }
 0x1b0   : > { %619 = shalt.err (!%p616_p3)
}
 0x1b1   : > { %550 = dma.vmem_to_hbm [thread:$0]  (%p735_p5), %s468_s23, 64, %s470_s29, %s454_s28  }
 0x1b2 PF: > { %p556_p4 = scmp.ge.s32.totalorder %s654_s27, 2  ;;  %s481_s16 = sand.u32 1, %s642_s24  }
 0x1b3   : > { %s482_s19 = scalar_lea.sflag [#allocation3], %s481_s16 }
 0x1b4   : > { %p553_p7 = pnand %p556_p4, %p739_p6 }
 0x1b6   : > { %p554_p8 = pneg %p553_p7 }
 0x1b8   : > { %637 = dma.done.wait (%p554_p8), %s482_s19, 64  }
 0x1b9   : > { %639 = vsyncadd (%p554_p8), %s482_s19, 4294967232  ;;  %p17_p9 = scmp.ge.s32.totalorder %s722_s30, 4   ;;  %s813_s24 = smov %s646_s25 }
 0x1ba   : > { %s814_s25 = smov %s650_s26  ;;  %s815_s26 = smov %s733_s10 }
 0x1bb   : > { %s816_s27 = smov %s722_s30  ;;  %19 = sbr.rel (!%p17_p9) target bundleno = 3 (0x3), region = 83 }
 0x1c0   :  { %488 = vsyncpa [#allocation3], 1 }
 0x1c1   :  { %490 = vsyncpa [#allocation3 + $0x1], 1 }

</bundles_post_ra>
